<compile_context>
chip_gen: v6e
topology: v6e:2x2x1
jax: 0.10.0
libtpu: 0.0.40
codegen_flags: <defaults>
</compile_context>

<pallas_src>
import functools
import math

import jax
import jax.numpy as jnp
from jax.experimental import pallas as pl
from jax.experimental.pallas import tpu as pltpu

_VMEM_LIMIT = 32 * 1024 * 1024
_LN_EPS = 1e-5


# ---------------------------------------------------------------------------
# small helpers
# ---------------------------------------------------------------------------

def _round_up(x, m):
    return ((x + m - 1) // m) * m


def _pad_rows(x, tile):
    n = x.shape[0]
    n_pad = _round_up(n, tile)
    if n_pad != n:
        x = jnp.pad(x, ((0, n_pad - n),) + ((0, 0),) * (x.ndim - 1))
    return x


def _row_tile(n):
    # Large tiles at scale (HBM roofline / per-step overhead amortization), small tiles
    # for the toy demo so the multi-step grid path is actually exercised.
    if n >= 512:
        return 512
    if n >= 256:
        return 256
    return 16


# ---------------------------------------------------------------------------
# Kernel 1: fused input projections
#   value  = (src @ Wv + bv) * mask
#   [off | logits] = (src+pos) @ [Woff | Wattn] + [boff | battn]   (single MXU matmul)
#   attn   = per-head softmax over (L*P) of logits (group matrix is a hoisted input)
# ---------------------------------------------------------------------------

def _input_proj_kernel(src_ref, pos_ref, mask_ref, wv_ref, bv_ref,
                       wqk_ref, bqk_ref, group_ref,
                       value_ref, off_ref, attn_ref, *, n_off):
    src = src_ref[...]
    q16 = (src + pos_ref[...]).astype(jnp.bfloat16)

    v = jnp.dot(src.astype(jnp.bfloat16), wv_ref[...],
                preferred_element_type=jnp.float32) + bv_ref[...]
    value_ref[...] = v * mask_ref[...]

    comb = jnp.dot(q16, wqk_ref[...],
                   preferred_element_type=jnp.float32) + bqk_ref[...]
    off_ref[...] = comb[:, :n_off]
    logits = comb[:, n_off:]

    # Per-head softmax: subtract the global row max (a per-row constant, valid inside
    # every head group), exponentiate, normalize with per-head sums via a block-diagonal
    # grouping matmul (group matrix is passed in, not rebuilt per grid step).
    m = jnp.max(logits, axis=-1, keepdims=True)
    e = jnp.exp(logits - m)
    denom = jnp.dot(e, group_ref[...], preferred_element_type=jnp.float32)
    attn_ref[...] = e / denom


def input_projections(src_p, pos_p, mask_p, wv, bv, wqk, bqk, group,
                      n_off, hlp, tn):
    n_pad, c = src_p.shape
    nqk = wqk.shape[1]
    row = lambda i: (i, 0)
    rep = lambda i: (0, 0)
    buf1 = pl.Buffered(1)
    return pl.pallas_call(
        functools.partial(_input_proj_kernel, n_off=n_off),
        out_shape=(
            jax.ShapeDtypeStruct((n_pad, c), jnp.float32),
            jax.ShapeDtypeStruct((n_pad, n_off), jnp.float32),
            jax.ShapeDtypeStruct((n_pad, hlp), jnp.float32),
        ),
        grid=(n_pad // tn,),
        in_specs=[
            pl.BlockSpec((tn, c), row),
            pl.BlockSpec((tn, c), row),
            pl.BlockSpec((tn, 1), row),
            pl.BlockSpec((c, c), rep, pipeline_mode=buf1),
            pl.BlockSpec((1, c), rep, pipeline_mode=buf1),
            pl.BlockSpec((c, nqk), rep, pipeline_mode=buf1),
            pl.BlockSpec((1, nqk), rep, pipeline_mode=buf1),
            pl.BlockSpec((hlp, hlp), rep, pipeline_mode=buf1),
        ],
        out_specs=(
            pl.BlockSpec((tn, c), row),
            pl.BlockSpec((tn, n_off), row),
            pl.BlockSpec((tn, hlp), row),
        ),
        compiler_params=pltpu.CompilerParams(
            dimension_semantics=("parallel",), vmem_limit_bytes=_VMEM_LIMIT),
    )(src_p, pos_p, mask_p, wv, bv.reshape(1, c), wqk, bqk.reshape(1, nqk), group)


# ---------------------------------------------------------------------------
# Kernel 2: deformable attention core (gather + weighted sum) fused with
#           output_proj + residual + LayerNorm1.
#
#   value_ref : token-major [S, C] slab for the current batch (Buffered(1)).
#   idx_ref   : SMEM (tq, H*L*P*4) int32 token indices (per-head, since offsets are
#               per-head).
#   w_ref     : VMEM (tq, H*L*P*4) f32 combined weights, consumed as vector rows.
#   acc_ref   : VMEM (tq, C) f32 scratch; stored once per tile through the fused epilogue.
# ---------------------------------------------------------------------------

def _deform_core_kernel(idx_ref, w_ref, value_ref, src_ref, wout_ref, bout_ref,
                        g_ref, beta_ref, o_ref, acc_ref, *, n_heads, dh, lpc):
    tq = o_ref.shape[0]

    def qbody(q, carry):
        wq = w_ref[pl.ds(q, 1), :]                      # (1, H*lpc) one vector load
        for h in range(n_heads):
            acc = jnp.zeros((1, dh), jnp.float32)
            for j in range(lpc):
                k = h * lpc + j
                tok = idx_ref[q, k]                     # SMEM scalar read
                vrow = value_ref[pl.ds(tok, 1), h * dh:(h + 1) * dh]
                acc = acc + wq[:, k:k + 1] * vrow       # broadcast FMA, weight from VMEM
            acc_ref[pl.ds(q, 1), h * dh:(h + 1) * dh] = acc
        return carry

    jax.lax.fori_loop(0, tq, qbody, 0)

    # Fused epilogue: output_proj + residual + LayerNorm1 on the whole (tq, C) tile.
    core = acc_ref[...]
    y = jnp.dot(core.astype(jnp.bfloat16), wout_ref[...],
                preferred_element_type=jnp.float32) + bout_ref[...]
    y = y + src_ref[...]
    mean = jnp.mean(y, axis=-1, keepdims=True)
    yc = y - mean
    var = jnp.mean(yc * yc, axis=-1, keepdims=True)
    o_ref[...] = yc * jax.lax.rsqrt(var + _LN_EPS) * g_ref[...] + beta_ref[...]


def deform_attention_core(idx_flat, w_flat, value_rows, src_flat,
                          wout, bout, gamma, beta,
                          n_heads, dh, lpc, tq, tiles_per_b):
    nq, hlpc = idx_flat.shape
    b, s, c = value_rows.shape
    row2 = lambda bi, qi: (bi * tiles_per_b + qi, 0)
    rep2 = lambda bi, qi: (0, 0)
    buf1 = pl.Buffered(1)
    # TODO(synk): at production scale, store the value slab in bf16 and/or page it per
    # level with manual make_async_copy double-buffering instead of keeping the whole f32
    # [S, C] slab resident; also pack the SMEM index table (int16 / flattened) to relieve
    # SMEM capacity.
    return pl.pallas_call(
        functools.partial(_deform_core_kernel, n_heads=n_heads, dh=dh, lpc=lpc),
        out_shape=jax.ShapeDtypeStruct((nq, c), jnp.float32),
        grid=(b, tiles_per_b),
        in_specs=[
            pl.BlockSpec((tq, hlpc), row2, memory_space=pltpu.MemorySpace.SMEM),
            pl.BlockSpec((tq, hlpc), row2),
            pl.BlockSpec((None, s, c), lambda bi, qi: (bi, 0, 0), pipeline_mode=buf1),
            pl.BlockSpec((tq, c), row2),
            pl.BlockSpec((c, c), rep2, pipeline_mode=buf1),
            pl.BlockSpec((1, c), rep2, pipeline_mode=buf1),
            pl.BlockSpec((1, c), rep2, pipeline_mode=buf1),
            pl.BlockSpec((1, c), rep2, pipeline_mode=buf1),
        ],
        out_specs=pl.BlockSpec((tq, c), row2),
        scratch_shapes=[pltpu.VMEM((tq, c), jnp.float32)],
        compiler_params=pltpu.CompilerParams(
            dimension_semantics=("parallel", "arbitrary"),
            vmem_limit_bytes=_VMEM_LIMIT),
    )(idx_flat, w_flat, value_rows, src_flat, wout, bout.reshape(1, c),
      gamma.reshape(1, c), beta.reshape(1, c))


# ---------------------------------------------------------------------------
# Kernel 3: FFN (linear1 + ReLU + linear2) + residual + LayerNorm2 (fused)
# ---------------------------------------------------------------------------

def _ffn_ln_kernel(x_ref, w1_ref, b1_ref, w2_ref, b2_ref, g_ref, beta_ref, o_ref):
    x = x_ref[...]
    h = jnp.dot(x.astype(jnp.bfloat16), w1_ref[...],
                preferred_element_type=jnp.float32) + b1_ref[...]
    h = jnp.maximum(h, 0.0)
    y = jnp.dot(h.astype(jnp.bfloat16), w2_ref[...],
                preferred_element_type=jnp.float32) + b2_ref[...]
    y = y + x
    mean = jnp.mean(y, axis=-1, keepdims=True)
    yc = y - mean
    var = jnp.mean(yc * yc, axis=-1, keepdims=True)
    o_ref[...] = yc * jax.lax.rsqrt(var + _LN_EPS) * g_ref[...] + beta_ref[...]


def ffn_ln(x_p, w1, b1, w2, b2, gamma, beta, tn):
    n_pad, c = x_p.shape
    f = w1.shape[1]
    row = lambda i: (i, 0)
    rep = lambda i: (0, 0)
    buf1 = pl.Buffered(1)
    return pl.pallas_call(
        _ffn_ln_kernel,
        out_shape=jax.ShapeDtypeStruct((n_pad, c), jnp.float32),
        grid=(n_pad // tn,),
        in_specs=[pl.BlockSpec((tn, c), row),
                  pl.BlockSpec((c, f), rep, pipeline_mode=buf1),
                  pl.BlockSpec((1, f), rep, pipeline_mode=buf1),
                  pl.BlockSpec((f, c), rep, pipeline_mode=buf1),
                  pl.BlockSpec((1, c), rep, pipeline_mode=buf1),
                  pl.BlockSpec((1, c), rep, pipeline_mode=buf1),
                  pl.BlockSpec((1, c), rep, pipeline_mode=buf1)],
        out_specs=pl.BlockSpec((tn, c), row),
        compiler_params=pltpu.CompilerParams(
            dimension_semantics=("parallel",), vmem_limit_bytes=_VMEM_LIMIT),
    )(x_p, w1, b1.reshape(1, f), w2, b2.reshape(1, c),
      gamma.reshape(1, c), beta.reshape(1, c))


# ---------------------------------------------------------------------------
# JAX glue: bilinear corner token indices + combined weights for the gather kernel.
# Token indices are into the token-major [S, C] value slab of the current batch.
# ---------------------------------------------------------------------------

def build_gather_tables(samp_loc, attn_w, spatial_shapes, level_start):
    b, s, h, n_lvl, p, _ = samp_loc.shape
    idx_lvls, w_lvls = [], []
    for l in range(n_lvl):
        hl, wl = spatial_shapes[l]
        start = level_start[l]
        loc = samp_loc[:, :, :, l]          # [B,S,H,P,2]
        aw = attn_w[:, :, :, l]             # [B,S,H,P]
        # grid_sample(bilinear, zero padding, align_corners=False): pix = loc*size - 0.5
        x = loc[..., 0] * wl - 0.5
        y = loc[..., 1] * hl - 0.5
        x0 = jnp.floor(x)
        y0 = jnp.floor(y)
        lx = x - x0
        ly = y - y0
        x0i = x0.astype(jnp.int32)
        y0i = y0.astype(jnp.int32)
        corners = [
            (x0i, y0i, (1.0 - lx) * (1.0 - ly)),
            (x0i + 1, y0i, lx * (1.0 - ly)),
            (x0i, y0i + 1, (1.0 - lx) * ly),
            (x0i + 1, y0i + 1, lx * ly),
        ]
        ci, cw = [], []
        for cx, cy, w in corners:
            valid = ((cx >= 0) & (cx < wl) & (cy >= 0) & (cy < hl)).astype(jnp.float32)
            tok = start + jnp.clip(cy, 0, hl - 1) * wl + jnp.clip(cx, 0, wl - 1)
            ci.append(tok)
            cw.append(aw * w * valid)
        idx_lvls.append(jnp.stack(ci, axis=-1))     # [B,S,H,P,4]
        w_lvls.append(jnp.stack(cw, axis=-1))
    idx = jnp.stack(idx_lvls, axis=3)               # [B,S,H,L,P,4]
    wgt = jnp.stack(w_lvls, axis=3)
    hlpc = h * n_lvl * p * 4
    return (idx.reshape(b, s, hlpc).astype(jnp.int32),
            wgt.reshape(b, s, hlpc).astype(jnp.float32))


# ---------------------------------------------------------------------------
# Full encoder-layer forward
# ---------------------------------------------------------------------------

def deformable_encoder_layer_forward(params, cfg, src, pos, reference_points,
                                     spatial_shapes, level_start_index,
                                     padding_mask=None):
    """src, pos: [B, Len, C]; reference_points: [B, Len, n_levels, 2] in [0,1]."""
    b, s, c = src.shape
    n_heads, n_levels, n_points = cfg["n_heads"], cfg["n_levels"], cfg["n_points"]
    dh = c // n_heads
    lp = n_levels * n_points
    hlp = n_heads * lp
    n_off = hlp * 2
    lpc = lp * 4

    # bf16 weights for the MXU (biases / LN params stay f32)
    wv = params["value_proj_w"].astype(jnp.bfloat16)
    wqk = jnp.concatenate([params["samp_off_w"], params["attn_w_w"]],
                          axis=1).astype(jnp.bfloat16)
    bqk = jnp.concatenate([params["samp_off_b"], params["attn_w_b"]], axis=0)
    wout = params["out_proj_w"].astype(jnp.bfloat16)
    w1 = params["lin1_w"].astype(jnp.bfloat16)
    w2 = params["lin2_w"].astype(jnp.bfloat16)

    # per-head softmax grouping matrix (hoisted out of kernel 1)
    head_of = jnp.arange(hlp, dtype=jnp.int32) // lp
    group = (head_of[:, None] == head_of[None, :]).astype(jnp.float32)

    n = b * s
    tn = _row_tile(n)
    src2 = _pad_rows(src.reshape(n, c), tn)
    pos2 = _pad_rows(pos.reshape(n, c), tn)
    if padding_mask is None:
        mask2 = jnp.ones((src2.shape[0], 1), jnp.float32)
    else:
        mask2 = _pad_rows(1.0 - padding_mask.reshape(n, 1).astype(jnp.float32), tn)

    # ---- fused value / (sampling-offset | attention-weight) projections ----
    value, samp_off, attn = input_projections(
        src2, pos2, mask2, wv, params["value_proj_b"], wqk, bqk, group,
        n_off, hlp, tn)

    value_rows = value[:n].reshape(b, s, c)                      # token-major slab
    samp_off = samp_off[:n].reshape(b, s, n_heads, n_levels, n_points, 2)
    attn = attn[:n].reshape(b, s, n_heads, n_levels, n_points)

    # sampling locations (offset_normalizer = stack([W, H]) per level)
    offset_normalizer = jnp.array([[w_, h_] for (h_, w_) in spatial_shapes], jnp.float32)
    samp_loc = (reference_points[:, :, None, :, None, :]
                + samp_off / offset_normalizer[None, None, None, :, None, :])

    corner_idx, corner_w = build_gather_tables(samp_loc, attn, spatial_shapes,
                                               level_start_index)

    # ---- gather-based deformable attention core + out_proj + residual + LN1 ----
    tq = 128 if s >= 128 else 8
    s_pad = _round_up(s, tq)
    src_q = src
    if s_pad != s:
        corner_idx = jnp.pad(corner_idx, ((0, 0), (0, s_pad - s), (0, 0)))
        corner_w = jnp.pad(corner_w, ((0, 0), (0, s_pad - s), (0, 0)))
        src_q = jnp.pad(src, ((0, 0), (0, s_pad - s), (0, 0)))
    tiles_per_b = s_pad // tq

    x1 = deform_attention_core(
        corner_idx.reshape(b * s_pad, -1),
        corner_w.reshape(b * s_pad, -1),
        value_rows,
        src_q.reshape(b * s_pad, c),
        wout, params["out_proj_b"], params["ln1_g"], params["ln1_b"],
        n_heads, dh, lpc, tq, tiles_per_b)

    # ---- FFN + residual + norm2 (dropout layers = identity at inference) ----
    n2 = b * s_pad
    tn2 = _row_tile(n2)
    x1p = _pad_rows(x1, tn2)
    out = ffn_ln(x1p, w1, params["lin1_b"], w2, params["lin2_b"],
                 params["ln2_g"], params["ln2_b"], tn2)
    return out[:n2].reshape(b, s_pad, c)[:, :s]


# ---------------------------------------------------------------------------
# Pure-JAX reference (independent gather path).  Matmul operands are cast to
# bf16 to mirror the kernels' deliberate precision policy (f32 accumulation);
# all other math is f32.
# ---------------------------------------------------------------------------

def _bfmm(x, w):
    return jnp.dot(x.astype(jnp.bfloat16), w.astype(jnp.bfloat16),
                   preferred_element_type=jnp.float32)


def _ref_layernorm(x, g, b, eps=_LN_EPS):
    m = jnp.mean(x, -1, keepdims=True)
    v = jnp.mean((x - m) ** 2, -1, keepdims=True)
    return (x - m) / jnp.sqrt(v + eps) * g + b


def _ref_ms_deform_core(value, spatial_shapes, level_start, samp_loc, attn):
    b, s, h, dh = value.shape
    _, q, _, n_lvl, p, _ = samp_loc.shape
    out = jnp.zeros((b, q, h, dh), jnp.float32)
    for l in range(n_lvl):
        hl, wl = spatial_shapes[l]
        start = level_start[l]
        val_l = value[:, start:start + hl * wl].reshape(b, hl, wl, h, dh)
        loc = samp_loc[:, :, :, l]
        aw = attn[:, :, :, l]
        x = loc[..., 0] * wl - 0.5
        y = loc[..., 1] * hl - 0.5
        x0 = jnp.floor(x).astype(jnp.int32)
        y0 = jnp.floor(y).astype(jnp.int32)
        lx = x - x0
        ly = y - y0
        bi = jnp.arange(b)[:, None, None, None]
        hi = jnp.arange(h)[None, None, :, None]
        for dx, dy, w in [(0, 0, (1 - lx) * (1 - ly)), (1, 0, lx * (1 - ly)),
                          (0, 1, (1 - lx) * ly), (1, 1, lx * ly)]:
            cx, cy = x0 + dx, y0 + dy
            valid = ((cx >= 0) & (cx < wl) & (cy >= 0) & (cy < hl)).astype(jnp.float32)
            g = val_l[bi, jnp.clip(cy, 0, hl - 1), jnp.clip(cx, 0, wl - 1), hi]
            out = out + jnp.sum((w * valid * aw)[..., None] * g, axis=3)
    return out


def reference_forward(params, cfg, src, pos, reference_points, spatial_shapes,
                      level_start_index, padding_mask=None):
    b, s, c = src.shape
    n_heads, n_levels, n_points = cfg["n_heads"], cfg["n_levels"], cfg["n_points"]
    dh = c // n_heads
    q = src + pos
    value = _bfmm(src, params["value_proj_w"]) + params["value_proj_b"]
    if padding_mask is not None:
        value = value * (1.0 - padding_mask[..., None].astype(jnp.float32))
    samp_off = (_bfmm(q, params["samp_off_w"]) + params["samp_off_b"]
                ).reshape(b, s, n_heads, n_levels, n_points, 2)
    attn = jax.nn.softmax((_bfmm(q, params["attn_w_w"]) + params["attn_w_b"])
                          .reshape(b, s, n_heads, n_levels * n_points), -1)
    attn = attn.reshape(b, s, n_heads, n_levels, n_points)
    normalizer = jnp.array([[w_, h_] for (h_, w_) in spatial_shapes], jnp.float32)
    samp_loc = (reference_points[:, :, None, :, None, :]
                + samp_off / normalizer[None, None, None, :, None, :])
    core = _ref_ms_deform_core(value.reshape(b, s, n_heads, dh), spatial_shapes,
                               level_start_index, samp_loc, attn)
    attn_out = _bfmm(core.reshape(b, s, c), params["out_proj_w"]) + params["out_proj_b"]
    x1 = _ref_layernorm(src + attn_out, params["ln1_g"], params["ln1_b"])
    h1 = jnp.maximum(_bfmm(x1, params["lin1_w"]) + params["lin1_b"], 0.0)
    h2 = _bfmm(h1, params["lin2_w"]) + params["lin2_b"]
    return _ref_layernorm(x1 + h2, params["ln2_g"], params["ln2_b"])


# ---------------------------------------------------------------------------

def init_params(key, d_model, d_ffn, n_heads, n_levels, n_points):
    ks = jax.random.split(key, 16)

    def lin(kw, kb, cin, cout, scale=1.0):
        w = jax.random.normal(kw, (cin, cout), jnp.float32) * (scale / math.sqrt(cin))
        b = jax.random.normal(kb, (cout,), jnp.float32) * 0.01
        return w, b

    p = {}
    p["value_proj_w"], p["value_proj_b"] = lin(ks[0], ks[1], d_model, d_model)
    p["samp_off_w"], p["samp_off_b"] = lin(ks[2], ks[3], d_model,
                                           n_heads * n_levels * n_points * 2, 0.5)
    p["attn_w_w"], p["attn_w_b"] = lin(ks[4], ks[5], d_model, n_heads * n_levels * n_points)
    p["out_proj_w"], p["out_proj_b"] = lin(ks[6], ks[7], d_model, d_model)
    p["lin1_w"], p["lin1_b"] = lin(ks[8], ks[9], d_model, d_ffn)
    p["lin2_w"], p["lin2_b"] = lin(ks[10], ks[11], d_ffn, d_model)
    p["ln1_g"] = jnp.ones((d_model,), jnp.float32)
    p["ln1_b"] = jnp.zeros((d_model,), jnp.float32)
    p["ln2_g"] = jnp.ones((d_model,), jnp.float32)
    p["ln2_b"] = jnp.zeros((d_model,), jnp.float32)
    return p


if __name__ == "__main__":
    # Small, module-consistent shapes.
    B = 2
    d_model, d_ffn = 32, 64
    n_heads, n_levels, n_points = 4, 2, 2
    spatial_shapes = ((4, 4), (2, 2))            # (H, W) per level
    level_start_index = (0, 16)
    Len = sum(h * w for h, w in spatial_shapes)  # 20 tokens

    cfg = dict(n_heads=n_heads, n_levels=n_levels, n_points=n_points)

    key = jax.random.PRNGKey(0)
    kp, k1, k2, k3 = jax.random.split(key, 4)
    params = init_params(kp, d_model, d_ffn, n_heads, n_levels, n_points)

    src = jax.random.normal(k1, (B, Len, d_model), jnp.float32)
    pos = jax.random.normal(k2, (B, Len, d_model), jnp.float32) * 0.1
    reference_points = jax.random.uniform(k3, (B, Len, n_levels, 2), jnp.float32)

    out = deformable_encoder_layer_forward(params, cfg, src, pos, reference_points,
                                           spatial_shapes, level_start_index,
                                           padding_mask=None)
    out = jax.block_until_ready(out)

    ref = jax.block_until_ready(
        reference_forward(params, cfg, src, pos, reference_points,
                          spatial_shapes, level_start_index))

    assert out.shape == (B, Len, d_model)
    assert bool(jnp.all(jnp.isfinite(out)))
    max_err = float(jnp.max(jnp.abs(out - ref)))
    assert max_err < 2e-2, f"mismatch vs reference: {max_err}"

    print("KERNEL_OK")
</pallas_src>

<mosaic_0001>
module attributes {stable_mosaic.version = 11 : i64} {
  func.func @_input_proj_kernel(%arg0: i32, %arg1: memref<16x32xf32, #tpu.memory_space<vmem>>, %arg2: memref<16x32xf32, #tpu.memory_space<vmem>>, %arg3: memref<16x1xf32, #tpu.memory_space<vmem>>, %arg4: memref<32x32xbf16, #tpu.memory_space<vmem>>, %arg5: memref<1x32xf32, #tpu.memory_space<vmem>>, %arg6: memref<32x48xbf16, #tpu.memory_space<vmem>>, %arg7: memref<1x48xf32, #tpu.memory_space<vmem>>, %arg8: memref<16x16xf32, #tpu.memory_space<vmem>>, %arg9: memref<16x32xf32, #tpu.memory_space<vmem>>, %arg10: memref<16x32xf32, #tpu.memory_space<vmem>>, %arg11: memref<16x16xf32, #tpu.memory_space<vmem>>) attributes {dimension_semantics = [#tpu.dimension_semantics<parallel>], iteration_bounds = array<i64: 3>, scalar_prefetch = 0 : i64, scratch_operands = 0 : i64, tpu.core_type = #tpu.core_type<tc>, window_params = [{transform_indices = @transform_0, window_bounds = array<i64: 16, 32>}, {transform_indices = @transform_1, window_bounds = array<i64: 16, 32>}, {transform_indices = @transform_2, window_bounds = array<i64: 16, 1>}, {pipeline_mode = #tpu.pipeline_mode<synchronous>, transform_indices = @transform_3, window_bounds = array<i64: 32, 32>}, {pipeline_mode = #tpu.pipeline_mode<synchronous>, transform_indices = @transform_4, window_bounds = array<i64: 1, 32>}, {pipeline_mode = #tpu.pipeline_mode<synchronous>, transform_indices = @transform_5, window_bounds = array<i64: 32, 48>}, {pipeline_mode = #tpu.pipeline_mode<synchronous>, transform_indices = @transform_6, window_bounds = array<i64: 1, 48>}, {pipeline_mode = #tpu.pipeline_mode<synchronous>, transform_indices = @transform_7, window_bounds = array<i64: 16, 16>}, {transform_indices = @transform_8, window_bounds = array<i64: 16, 32>}, {transform_indices = @transform_9, window_bounds = array<i64: 16, 32>}, {transform_indices = @transform_10, window_bounds = array<i64: 16, 16>}]} {
    %c0 = arith.constant 0 : index
    %c0_0 = arith.constant 0 : index
    %0 = vector.load %arg1[%c0, %c0_0] : memref<16x32xf32, #tpu.memory_space<vmem>>, vector<16x32xf32>
    %c0_1 = arith.constant 0 : index
    %c0_2 = arith.constant 0 : index
    %1 = vector.load %arg2[%c0_1, %c0_2] : memref<16x32xf32, #tpu.memory_space<vmem>>, vector<16x32xf32>
    %2 = arith.addf %0, %1 : vector<16x32xf32>
    %3 = arith.truncf %2 : vector<16x32xf32> to vector<16x32xbf16>
    %4 = arith.truncf %0 : vector<16x32xf32> to vector<16x32xbf16>
    %c0_3 = arith.constant 0 : index
    %c0_4 = arith.constant 0 : index
    %5 = vector.load %arg4[%c0_3, %c0_4] : memref<32x32xbf16, #tpu.memory_space<vmem>>, vector<32x32xbf16>
    %cst = arith.constant dense<0.000000e+00> : vector<16x32xf32>
    %6 = tpu.matmul %4, %5, %cst {dimension_numbers = #tpu.dot_dimension_numbers<[1], [0], [0], [1], [0, 0, 1, 1], [], []>} : vector<16x32xbf16>, vector<32x32xbf16>, vector<16x32xf32> -> vector<16x32xf32>
    %c0_5 = arith.constant 0 : index
    %c0_6 = arith.constant 0 : index
    %7 = vector.load %arg5[%c0_5, %c0_6] : memref<1x32xf32, #tpu.memory_space<vmem>>, vector<1x32xf32>
    %8 = vector.broadcast %7 : vector<1x32xf32> to vector<16x32xf32>
    %9 = arith.addf %6, %8 : vector<16x32xf32>
    %c0_7 = arith.constant 0 : index
    %c0_8 = arith.constant 0 : index
    %10 = vector.load %arg3[%c0_7, %c0_8] : memref<16x1xf32, #tpu.memory_space<vmem>>, vector<16x1xf32>
    %11 = vector.broadcast %10 : vector<16x1xf32> to vector<16x32xf32>
    %12 = arith.mulf %9, %11 : vector<16x32xf32>
    %c0_9 = arith.constant 0 : index
    %c0_10 = arith.constant 0 : index
    %13 = vector.load %arg9[%c0_9, %c0_10] : memref<16x32xf32, #tpu.memory_space<vmem>>, vector<16x32xf32>
    tpu.vector_store %arg9[%c0_9, %c0_10], %12 {strides = array<i32>} : memref<16x32xf32, #tpu.memory_space<vmem>>, vector<16x32xf32>,
    %c0_11 = arith.constant 0 : index
    %c0_12 = arith.constant 0 : index
    %14 = vector.load %arg6[%c0_11, %c0_12] : memref<32x48xbf16, #tpu.memory_space<vmem>>, vector<32x48xbf16>
    %cst_13 = arith.constant dense<0.000000e+00> : vector<16x48xf32>
    %15 = tpu.matmul %3, %14, %cst_13 {dimension_numbers = #tpu.dot_dimension_numbers<[1], [0], [0], [1], [0, 0, 1, 1], [], []>} : vector<16x32xbf16>, vector<32x48xbf16>, vector<16x48xf32> -> vector<16x48xf32>
    %c0_14 = arith.constant 0 : index
    %c0_15 = arith.constant 0 : index
    %16 = vector.load %arg7[%c0_14, %c0_15] : memref<1x48xf32, #tpu.memory_space<vmem>>, vector<1x48xf32>
    %17 = vector.broadcast %16 : vector<1x48xf32> to vector<16x48xf32>
    %18 = arith.addf %15, %17 : vector<16x48xf32>
    %19 = vector.extract_strided_slice %18 {offsets = [0, 0], sizes = [16, 32], strides = [1, 1]} : vector<16x48xf32> to vector<16x32xf32>
    %c0_16 = arith.constant 0 : index
    %c0_17 = arith.constant 0 : index
    %20 = vector.load %arg10[%c0_16, %c0_17] : memref<16x32xf32, #tpu.memory_space<vmem>>, vector<16x32xf32>
    tpu.vector_store %arg10[%c0_16, %c0_17], %19 {strides = array<i32>} : memref<16x32xf32, #tpu.memory_space<vmem>>, vector<16x32xf32>,
    %21 = vector.extract_strided_slice %18 {offsets = [0, 32], sizes = [16, 16], strides = [1, 1]} : vector<16x48xf32> to vector<16x16xf32>
    %cst_18 = arith.constant dense<0xFF800000> : vector<16xf32>
    %22 = vector.multi_reduction <maximumf>, %21, %cst_18 [1] : vector<16x16xf32> to vector<16xf32>
    %23 = vector.shape_cast %22 : vector<16xf32> to vector<16x1xf32>
    %24 = vector.broadcast %23 : vector<16x1xf32> to vector<16x16xf32>
    %25 = arith.subf %21, %24 : vector<16x16xf32>
    %26 = math.exp %25 : vector<16x16xf32>
    %c0_19 = arith.constant 0 : index
    %c0_20 = arith.constant 0 : index
    %27 = vector.load %arg8[%c0_19, %c0_20] : memref<16x16xf32, #tpu.memory_space<vmem>>, vector<16x16xf32>
    %cst_21 = arith.constant dense<0.000000e+00> : vector<16x16xf32>
    %28 = tpu.matmul %26, %27, %cst_21 {dimension_numbers = #tpu.dot_dimension_numbers<[1], [0], [0], [1], [0, 0, 1, 1], [], []>} : vector<16x16xf32>, vector<16x16xf32>, vector<16x16xf32> -> vector<16x16xf32>
    %29 = arith.divf %26, %28 : vector<16x16xf32>
    %c0_22 = arith.constant 0 : index
    %c0_23 = arith.constant 0 : index
    %30 = vector.load %arg11[%c0_22, %c0_23] : memref<16x16xf32, #tpu.memory_space<vmem>>, vector<16x16xf32>
    tpu.vector_store %arg11[%c0_22, %c0_23], %29 {strides = array<i32>} : memref<16x16xf32, #tpu.memory_space<vmem>>, vector<16x16xf32>,
    return
  }
  func.func @transform_0(%arg0: i32) -> (i32, i32) {
    %c0_i32 = arith.constant 0 : i32
    %c0_i32_0 = arith.constant 0 : i32
    return %arg0, %c0_i32 : i32, i32
  }
  func.func @transform_1(%arg0: i32) -> (i32, i32) {
    %c0_i32 = arith.constant 0 : i32
    %c0_i32_0 = arith.constant 0 : i32
    return %arg0, %c0_i32 : i32, i32
  }
  func.func @transform_2(%arg0: i32) -> (i32, i32) {
    %c0_i32 = arith.constant 0 : i32
    %c0_i32_0 = arith.constant 0 : i32
    return %arg0, %c0_i32 : i32, i32
  }
  func.func @transform_3(%arg0: i32) -> (i32, i32) {
    %c0_i32 = arith.constant 0 : i32
    %c0_i32_0 = arith.constant 0 : i32
    %c0_i32_1 = arith.constant 0 : i32
    return %c0_i32, %c0_i32_0 : i32, i32
  }
  func.func @transform_4(%arg0: i32) -> (i32, i32) {
    %c0_i32 = arith.constant 0 : i32
    %c0_i32_0 = arith.constant 0 : i32
    %c0_i32_1 = arith.constant 0 : i32
    return %c0_i32, %c0_i32_0 : i32, i32
  }
  func.func @transform_5(%arg0: i32) -> (i32, i32) {
    %c0_i32 = arith.constant 0 : i32
    %c0_i32_0 = arith.constant 0 : i32
    %c0_i32_1 = arith.constant 0 : i32
    return %c0_i32, %c0_i32_0 : i32, i32
  }
  func.func @transform_6(%arg0: i32) -> (i32, i32) {
    %c0_i32 = arith.constant 0 : i32
    %c0_i32_0 = arith.constant 0 : i32
    %c0_i32_1 = arith.constant 0 : i32
    return %c0_i32, %c0_i32_0 : i32, i32
  }
  func.func @transform_7(%arg0: i32) -> (i32, i32) {
    %c0_i32 = arith.constant 0 : i32
    %c0_i32_0 = arith.constant 0 : i32
    %c0_i32_1 = arith.constant 0 : i32
    return %c0_i32, %c0_i32_0 : i32, i32
  }
  func.func @transform_8(%arg0: i32) -> (i32, i32) {
    %c0_i32 = arith.constant 0 : i32
    %c0_i32_0 = arith.constant 0 : i32
    return %arg0, %c0_i32 : i32, i32
  }
  func.func @transform_9(%arg0: i32) -> (i32, i32) {
    %c0_i32 = arith.constant 0 : i32
    %c0_i32_0 = arith.constant 0 : i32
    return %arg0, %c0_i32 : i32, i32
  }
  func.func @transform_10(%arg0: i32) -> (i32, i32) {
    %c0_i32 = arith.constant 0 : i32
    %c0_i32_0 = arith.constant 0 : i32
    return %arg0, %c0_i32 : i32, i32
  }
}

</mosaic_0001>

<bundles_post_ra>
// kernel: tpu_custom_call.1
= control target key start
LH: loop header
LB: loop body
LE: loop exit
PB: predicated region body
PF: predicated region fallthrough
CT: control target
= control target key end

     0   :  { %s1024_s13 = smov 0   ;;  %s1099_s0 = inlined_call_operand.vmem [shape: f32[48,32], index: 0, kind: input, shape index: {}]   ;;  %s1100_s1 = inlined_call_operand.vmem [shape: f32[48,32], index: 1, kind: input, shape index: {}]   ;;  %s1101_s2 = inlined_call_operand.vmem [shape: f32[48,1], index: 2, kind: input, shape index: {}]   ;;  %s1102_s3 = inlined_call_operand.vmem [shape: bf16[32,32], index: 3, kind: input, shape index: {}]   ;;  %s1103_s4 = inlined_call_operand.vmem [shape: f32[1,32], index: 4, kind: input, shape index: {}]   ;;  %s1104_s5 = inlined_call_operand.vmem [shape: bf16[32,48], index: 5, kind: input, shape index: {}]   ;;  %s1105_s6 = inlined_call_operand.vmem [shape: f32[1,48], index: 6, kind: input, shape index: {}]   ;;  %s1106_s7 = inlined_call_operand.vmem [shape: f32[16,16], index: 7, kind: input, shape index: {}]   ;;  %s1107_s8 = inlined_call_operand.vmem [shape: f32[48,32], index: 8, kind: output, shape index: {0}]   ;;  %s1108_s9 = inlined_call_operand.vmem [shape: f32[48,32], index: 9, kind: output, shape index: {1}]   ;;  %s1109_s10 = inlined_call_operand.vmem [shape: f32[48,16], index: 10, kind: output, shape index: {2}]  }
   0x1 LB: > { %s867_s14 = sadd.s32 4294967295, %s962_s13   ;;  %p871_p0 = scmp.ge.s32.totalorder %s962_s13, 1  ;;  %s962_s13 = sphi %s1024_s13, %s21_s13  }
   0x2   : > { %p340_p1 = scmp.lt.s32.totalorder %s962_s13, 4 }
   0x4   : > { %p341_p2 = pnand %p871_p0, %p340_p1 }
   0x5   : > { %s872_s19 = sshll.u32 (!%p341_p2), %s867_s14, 1  ;;  %s966_s22 = smov (!%p341_p2), 96  }
   0x6   : > { %344 = sbr.rel (%p341_p2) target bundleno = 937 (0x3a9), region = 52  ;;  %p399_p3 = scmp.lt.s32.totalorder (!%p341_p2), %s872_s19, 5 }
   0xb   : > { %v944_v0 = vld [vmem:[%s1104_s5 + $0x8] sm:$0xff]   ;;  %v964_v1 = vmov 0.0   ;;  %v945_v2 = vld [vmem:[%s1104_s5] sm:$0xff]   ;;  %vm965_vm0 = vmmov 0   ;;  %s1111_s19 = smov (!%p399_p3, %s872_s19), 5  ;;  %vm466_vm1 = vcmask 261120  }
   0xc   : > { %914 = vmatprep.subr.bf16.mxu1 %v964_v1  ;;  %906 = vmatprep.subr.bf16.mxu0 %v964_v1  ;;  %s1038_s20 = sshll.u32 %s1111_s19, 3  ;;  %v888_v10 = vld [vmem:[%s1105_s6] ss:$0 sm:$0xff]  ;;  %vm596_vm2 = vcmask 392448   ;;  %v946_v19 = vld [vmem:[%s1102_s3 + $0x8] sm:$0xff]   ;;  %vm617_vm3 = vcmask 130048  }
   0xd   : > { %915 = vmatpush3.bf16.msra.mxu1 %v944_v0  ;;  %918 = vmatprep.mubr.msk.bf16.mxu1 %vm965_vm0, %v964_v1  ;;  %s402_s23 = scalar_lea.vmem %s1099_s0, %s1038_s20  ;;  %s408_s26 = scalar_lea.vmem %s1100_s1, %s1038_s20  ;;  %v947_v20 = vld [vmem:[%s1102_s3] sm:$0xff]   ;;  %v610_v21 = vld [vmem:[%s1106_s7 + $0x8] sm:$0xff]  ;;  %v967_v38 = vmov 0  }
   0xe   : > { %916 = vmatprep.subr.bf16.mxu1 %v964_v1  ;;  %910 = vmatprep.mubr.msk.bf16.mxu0 %vm965_vm0, %v964_v1  ;;  %v435_v3 = vld [vmem:[%s402_s23] sm:$0xff]  ;;  %v436_v4 = vld [vmem:[%s402_s23 + $0x8] sm:$0xff]  ;;  %s426_s11 = scalar_lea.vmem %s1108_s9, %s1038_s20  ;;  %s414_s25 = scalar_lea.vmem %s1101_s2, %s1038_s20 }
   0xf   : > { %v437_v5 = vld [vmem:[%s408_s26] sm:$0xff]  ;;  %v438_v6 = vld [vmem:[%s408_s26 + $0x8] sm:$0xff]  ;;  %907 = vmatpush3.bf16.msra.mxu0 %v946_v19  ;;  %v442_v22 = vpack.c.bf16 %v436_v4, %v435_v3  ;;  %942 = vset.pattern.permute.xlu1 %v967_v38  ;;  %s968_s26 = smov 32   ;;  %s432_s15 = scalar_lea.vmem %s1109_s10, %s1038_s20 }
  0x10   : > { %v439_v7 = vadd.f32 %v437_v5, %v435_v3  ;;  %v440_v8 = vadd.f32 %v438_v6, %v436_v4  ;;  %908 = vmatprep.subr.bf16.mxu0 %v964_v1  ;;  %v609_v23 = vld [vmem:[%s1106_s7] sm:$0xff]  ;;  %943 = vset.pattern.permute.xlu0 %v967_v38  ;;  %v512_v42 = vld [vmem:[%s414_s25 + $0x8] sm:$0xff] }
  0x11   : > { %917 = vmatpush3.bf16.msra.mxu1 %v945_v2  ;;  %v511_v41 = vld [vmem:[%s414_s25] sm:$0xff] }
  0x12   : > { %v441_v9 = vpack.c.bf16 %v440_v8, %v439_v7  ;;  %v884_v45 = vld [vmem:[%s1103_s4] ss:$0 sm:$0xff] }
  0x13   : > { %909 = vmatpush3.bf16.msra.mxu0 %v947_v20 }
  0x14   : > { %919 = vmatmul.mubr.msk.bf16.vlgmr.msra.gmra.mxu1 %vm466_vm1, %v441_v9  ;;  %922 = vmatprep.subr.mxu0 %v610_v21 }
  0x16   : > { %911 = vmatmul.mubr.msk.bf16.vlgmr.msra.gmra.mxu0 %vm466_vm1, %v442_v22 }
  0x17   : > { %923 = vmatpush3.msra.mxu0 %v610_v21 }
  0x18   : > { %924 = vmatprep.subr.mxu0 %v609_v23 }
  0x19   : > { %925 = vmatpush3.msra.mxu0 %v609_v23 }
  0xd4   : > { %v587_v11 = vpop.f32.mrf.mxu1 }
  0xd5   : > { %v588_v12 = vadd.f32 %v888_v10, %v587_v11 }
  0xd6   : > { %v920_v13 = vpop.f32.mrf.mxu1  ;;  %v504_v32 = vpop.f32.mrf.mxu0 }
  0xd7   : > { %594 = vst.msk [vmem:[%s426_s11] sm:$0xff] %vm466_vm1, %v588_v12  ;;  %v597_v14 = vsel %vm596_vm2, %v588_v12, -inf  ;;  %v505_v46 = vadd.f32 %v884_v45, %v504_v32 }
  0xd8   : > { %598 = vmax.xlane.f32.xlu0 %v597_v14  ;;  %v590_v15 = vpop.f32.mrf.mxu1  ;;  %v912_v33 = vpop.f32.mrf.mxu0 }
  0xd9   : > { %v591_v16 = vadd.f32 %v888_v10, %v590_v15 }
  0xda   : > { %v921_v17 = vpop.f32.mrf.mxu1  ;;  %v507_v34 = vpop.f32.mrf.mxu0 }
  0xdb   : > { %595 = vst.msk [vmem:[%s426_s11 + $0x8] sm:$0xff] %vm466_vm1, %v591_v16  ;;  %v600_v18 = vsel %vm596_vm2, %v591_v16, -inf  ;;  %s420_s11 = scalar_lea.vmem %s1107_s8, %s1038_s20  ;;  %v508_v50 = vadd.f32 %v884_v45, %v507_v34 }
  0xdc   : > { %601 = vmax.xlane.f32.xlu0 %v600_v18  ;;  %v913_v35 = vpop.f32.mrf.mxu0 }
 0x161   : > { %v599_v24 = vpop.xlane.xlu0 %598 }
 0x162   : > { %v603_v25 = vsub.f32 %v588_v12, %v599_v24 }
 0x164   : > { %v605_v26 = vmul.f32 1.442695, %v603_v25 }
 0x165   : > { %v602_v27 = vpop.xlane.xlu0 %601 }
 0x166   : > { %948 = vpow2.f32 %v605_v26  ;;  %v604_v28 = vsub.f32 %v591_v16, %v602_v27 }
 0x168   : > { %v607_v29 = vmul.f32 1.442695, %v604_v28 }
 0x16a   : > { %950 = vpow2.f32 %v607_v29 }
 0x173   : > { %v949_v30 = vpop.eup %948 }
 0x174   : > { %613 = vrot.lane.b32.xlu1 %v949_v30, %s966_s22 }
 0x177   : > { %v951_v31 = vpop.eup %950 }
 0x178   : > { %615 = vrot.lane.b32.xlu1 %v951_v31, %s966_s22 }
 0x1e6   : > { %v614_v36 = vpop.permute.xlu1 %613 }
 0x1e7   : > { %926 = vmatprep.mubr.msk.f32.mxu0 %vm617_vm3, %v614_v36 }
 0x1ea   : > { %v616_v37 = vpop.permute.xlu1 %615 }
 0x1eb   : > { %927 = vmatmul.mubr.msk.f32.vlgmr.msra.gmra.mxu0 %vm617_vm3, %v616_v37 }
 0x2ab   : > { %v928_v39 = vpop.f32.mrf.mxu0 }
 0x2ac   : > { %701 = vrot.lane.b32.xlu1 %v928_v39, %s968_s26 }
 0x2ad   : > { %v688_v40 = vpop.f32.mrf.mxu0 }
 0x2ae   : > { %699 = vrot.lane.b32.xlu0 %v688_v40, %s968_s26 }
 0x2b0   : > { %515 = vperm.xlu1 %942, %v511_v41  }
 0x2b4   : > { %520 = vperm.xlu1 %942, %v512_v42  }
 0x31e   : > { %v702_v43 = vpop.permute.xlu1 %701 }
 0x320   : > { %v700_v44 = vpop.permute.xlu0 %699 }
 0x321   : > { %952 = vrcp.f32 %v700_v44 }
 0x322   : > { %954 = vrcp.f32 %v702_v43 }
 0x32b   : > { %v516_v47 = vpop.permute.xlu1 %515 }
 0x32c   : > { %v523_v48 = vmul.f32 %v516_v47, %v505_v46 }
 0x32e   : > { %v953_v49 = vpop.eup %952  ;;  %525 = vst.msk [vmem:[%s420_s11] sm:$0xff] %vm466_vm1, %v523_v48 }
 0x32f   : > { %v521_v51 = vpop.permute.xlu1 %520  ;;  %v706_v52 = vmul.f32 %v953_v49, %v949_v30  ;;  %v955_v53 = vpop.eup %954 }
 0x330   : > { %v524_v54 = vmul.f32 %v521_v51, %v508_v50  ;;  %v708_v55 = vmul.f32 %v955_v53, %v951_v31 }
 0x331   : > { %711 = vrot.lane.b32.xlu1 %v706_v52, %s966_s22 }
 0x332   : > { %526 = vst.msk [vmem:[%s420_s11 + $0x8] sm:$0xff] %vm466_vm1, %v524_v54 }
 0x335   : > { %713 = vrot.lane.b32.xlu1 %v708_v55, %s966_s22 }
 0x3a3   : > { %v712_v56 = vpop.permute.xlu1 %711 }
 0x3a4   : > { %717 = vst.msk [vmem:[%s432_s15] sm:$0xff] %vm617_vm3, %v712_v56 }
 0x3a7   : > { %v714_v57 = vpop.permute.xlu1 %713 }
 0x3a8   : > { %718 = vst.msk [vmem:[%s432_s15 + $0x8] sm:$0xff] %vm617_vm3, %v714_v57 }
 0x3a9 PF: > { %s21_s13 = sadd.s32 1, %s962_s13  }
 0x3aa   : > { %p18_p4 = scmp.ge.s32.totalorder %s21_s13, 5  }
 0x3ac   :  { %20 = sbr.rel (!%p18_p4) target bundleno = 1 (0x1), region = 112 }

</bundles_post_ra>
